<compile_context>
chip_gen: v7x
topology: tpu7x:2x2x1
jax: 0.10.0
libtpu: 0.0.40
codegen_flags: <defaults>
</compile_context>

<pallas_src>
import math

import jax
import jax.numpy as jnp
from jax.experimental import pallas as pl
from jax.experimental.pallas import tpu as pltpu

IN_DIM = 16
OUT_DIM = 8
FEATURE_DIM = 32
MEMORY_DIM = 32
DEPTH = 3          # depth // 3 == 1 hidden layer per MLP, 1-layer LSTM
LABEL_DIM = 1      # classify=True -> label_dim = 1
BATCH = 8

CROWN_HIDDEN = MEMORY_DIM // 2   # 16

# ---- packed parameter slab layout: (56, 128) f32, all offsets static ----
#   rows [ 0:32), lanes [  0: 96)  W_tg  (32, 96) = w2n @ wih_igo   (nerves-L2 fused into gates)
#   rows [ 0:32), lanes [ 96:112)  wc1h  (32, 16)
#   rows [32:48), lanes [  0: 48)  W_s   (16, 48) = [w1n[:IN_DIM] | wc1s]
#   rows [32:48), lanes [ 48: 56)  wc2   (16,  8)
#   row   48    , lanes [  0: 96)  b_tg  ( 1, 96) = b2n @ wih_igo + (b_ih+b_hh)[igo]
#   row   48    , lanes [ 96:104)  bc2   ( 1,  8)
#   row   49    , lanes [  0: 48)  b_s   ( 1, 48) = [b1n | bc1]
SLAB_ROWS = 56
SLAB_COLS = 128


def _gelu_exact(x):
    # nn.GELU() default in PyTorch is the exact (erf-based) GELU.
    return 0.5 * x * (1.0 + jax.lax.erf(x * (1.0 / math.sqrt(2.0))))


def agi_kernel(sense_ref, slab_ref, out_ref):
    m = MEMORY_DIM
    sense = sense_ref[...]                                              # (TB, 16)

    # ---- fused sense matmul: nerves hidden (pre-GELU) | crown sense part ----
    w_s = slab_ref[32:48, 0:48]
    b_s = slab_ref[49:50, 0:48]
    hs = jnp.dot(sense, w_s, preferred_element_type=jnp.float32) + b_s  # (TB, 48)
    h1 = _gelu_exact(hs[:, 0:FEATURE_DIM])                              # (TB, 32)
    crown_sense = hs[:, FEATURE_DIM:FEATURE_DIM + CROWN_HIDDEN]         # (TB, 16), bc1 folded in

    # ---- nerves-L2 + LSTM gate matmul, fused host-side into W_tg / b_tg ----
    # h0 == 0 (W_hh term vanishes), c0 == 0 (forget gate pruned host-side).
    # Column order after pruning: [i | g | o].
    w_tg = slab_ref[0:32, 0:3 * m]
    b_tg = slab_ref[48:49, 0:3 * m]
    gates = jnp.dot(h1, w_tg, preferred_element_type=jnp.float32) + b_tg  # (TB, 96)
    s = jax.nn.sigmoid(gates)        # full-width EUP push
    t = jnp.tanh(gates)              # full-width EUP push
    i_g = s[:, 0:m]
    g_g = t[:, m:2 * m]
    o_g = s[:, 2 * m:3 * m]
    recollection = o_g * jnp.tanh(i_g * g_g)                             # (TB, 32)

    # ---- crown MLP (sense contribution + bias already in crown_sense) ----
    wc1h = slab_ref[0:32, 96:96 + CROWN_HIDDEN]
    hc = _gelu_exact(
        crown_sense
        + jnp.dot(recollection, wc1h, preferred_element_type=jnp.float32))
    wc2 = slab_ref[32:48, 48:48 + OUT_DIM]
    bc2 = slab_ref[48:49, 96:96 + OUT_DIM]
    out_ref[...] = jnp.dot(hc, wc2, preferred_element_type=jnp.float32) + bc2


def agi_gradient_forward(sense, slab, *, batch_tile=None):
    """forward(sense) with the default empty label (inference path).

    Batched over B with a 1-D grid; the weight slab index_map is constant so
    the (28 KiB) slab is DMA'd once and stays VMEM-resident across the grid.
    """
    B = sense.shape[0]
    if batch_tile is None:
        batch_tile = B if B <= 256 else 256
    assert B % batch_tile == 0
    assert batch_tile == B or batch_tile % 8 == 0
    grid = (B // batch_tile,)
    return pl.pallas_call(
        agi_kernel,
        out_shape=jax.ShapeDtypeStruct((B, OUT_DIM), jnp.float32),
        grid_spec=pltpu.PrefetchScalarGridSpec(
            num_scalar_prefetch=0,
            grid=grid,
            in_specs=[
                pl.BlockSpec((batch_tile, IN_DIM), lambda i: (i, 0)),
                pl.BlockSpec((SLAB_ROWS, SLAB_COLS), lambda i: (0, 0)),  # resident
            ],
            out_specs=pl.BlockSpec((batch_tile, OUT_DIM), lambda i: (i, 0)),
        ),
        compiler_params=pltpu.CompilerParams(
            dimension_semantics=("parallel",)),
    )(sense, slab)


def init_params(key):
    """Deterministic synthetic init matching the PyTorch parameter shapes."""
    ks = jax.random.split(key, 8)

    def lin(k, fan_in, fan_out):
        kw, kb = jax.random.split(k)
        bound = 1.0 / math.sqrt(fan_in)
        w = jax.random.uniform(kw, (fan_in, fan_out), jnp.float32, -bound, bound)
        b = jax.random.uniform(kb, (1, fan_out), jnp.float32, -bound, bound)
        return w, b

    # nerves = MLP(in_dim + label_dim -> feature_dim, hidden=feature_dim, depth=1, GELU)
    w1n, b1n = lin(ks[0], IN_DIM + LABEL_DIM, FEATURE_DIM)
    w2n, b2n = lin(ks[1], FEATURE_DIM, FEATURE_DIM)

    # hippocampus = nn.LSTM(feature_dim, memory_dim, 1): weight_ih stored transposed,
    # b_ih and b_hh combined; weight_hh unused (h0 == null memory).
    bound = 1.0 / math.sqrt(MEMORY_DIM)
    wih = jax.random.uniform(ks[2], (FEATURE_DIM, 4 * MEMORY_DIM), jnp.float32, -bound, bound)
    bih = jax.random.uniform(ks[3], (1, 4 * MEMORY_DIM), jnp.float32, -bound, bound)
    bhh = jax.random.uniform(ks[4], (1, 4 * MEMORY_DIM), jnp.float32, -bound, bound)

    # crown = MLP(in_dim + memory_dim -> out_dim, hidden=memory_dim//2, depth=1, GELU)
    wc1, bc1 = lin(ks[5], IN_DIM + MEMORY_DIM, CROWN_HIDDEN)
    wc2, bc2 = lin(ks[6], CROWN_HIDDEN, OUT_DIM)

    return dict(w1n=w1n, b1n=b1n, w2n=w2n, b2n=b2n,
                wih=wih, bih=bih + bhh,
                wc1s=wc1[:IN_DIM], wc1h=wc1[IN_DIM:], bc1=bc1,
                wc2=wc2, bc2=bc2)


def pack_params(params):
    """Pack all parameters into one (56, 128) f32 slab (single small DMA).

    Host-side algebraic fusions (valid for the single-step, null-memory path):
      * W_s = [w1n[:IN_DIM] | wc1s], b_s = [b1n | bc1]   (zero-label row dropped)
      * forget gate pruned (c0 == 0): keep [i | g | o] gate columns
      * nerves second Linear folded into the gate matmul:
          W_tg = w2n @ wih_igo,  b_tg = b2n @ wih_igo + bih_igo
    """
    m = MEMORY_DIM
    w_s = jnp.concatenate([params['w1n'][:IN_DIM], params['wc1s']], axis=1)   # (16, 48)
    b_s = jnp.concatenate([params['b1n'], params['bc1']], axis=1)             # (1, 48)

    wih, bih = params['wih'], params['bih']
    wih_igo = jnp.concatenate([wih[:, 0:m], wih[:, 2 * m:3 * m], wih[:, 3 * m:4 * m]], axis=1)
    bih_igo = jnp.concatenate([bih[:, 0:m], bih[:, 2 * m:3 * m], bih[:, 3 * m:4 * m]], axis=1)
    w_tg = params['w2n'] @ wih_igo                       # (32, 96)
    b_tg = params['b2n'] @ wih_igo + bih_igo             # (1, 96)

    slab = jnp.zeros((SLAB_ROWS, SLAB_COLS), jnp.float32)

    def put(slab, row, col, arr):
        r, c = arr.shape
        return slab.at[row:row + r, col:col + c].set(arr)

    slab = put(slab, 0, 0, w_tg)
    slab = put(slab, 0, 96, params['wc1h'])
    slab = put(slab, 32, 0, w_s)
    slab = put(slab, 32, 48, params['wc2'])
    slab = put(slab, 48, 0, b_tg)
    slab = put(slab, 48, 96, params['bc2'])
    slab = put(slab, 49, 0, b_s)
    return slab


def reference_forward(sense, params):
    """Pure-JAX reference of the full original forward pass (correctness check)."""
    label = jnp.zeros((sense.shape[0], LABEL_DIM), jnp.float32)
    x1 = jnp.concatenate([sense, label], -1)
    h = _gelu_exact(x1 @ params['w1n'] + params['b1n'])
    thought = h @ params['w2n'] + params['b2n']
    gates = thought @ params['wih'] + params['bih']
    m = MEMORY_DIM
    i = jax.nn.sigmoid(gates[:, :m])
    f = jax.nn.sigmoid(gates[:, m:2 * m])          # multiplies c0 == 0
    g = jnp.tanh(gates[:, 2 * m:3 * m])
    o = jax.nn.sigmoid(gates[:, 3 * m:])
    c = f * 0.0 + i * g
    rec = o * jnp.tanh(c)
    hc = _gelu_exact(sense @ params['wc1s'] + rec @ params['wc1h'] + params['bc1'])
    return hc @ params['wc2'] + params['bc2']


if __name__ == "__main__":
    key = jax.random.PRNGKey(0)
    kp, kx = jax.random.split(key)
    params = init_params(kp)
    slab = pack_params(params)

    # ---- single-tile path (B == batch_tile -> grid of 1) ----
    sense = jax.random.normal(kx, (BATCH, IN_DIM), jnp.float32)
    out = jax.block_until_ready(agi_gradient_forward(sense, slab))
    ref = reference_forward(sense, params)
    assert out.shape == (BATCH, OUT_DIM), out.shape
    max_err = float(jnp.max(jnp.abs(out - ref)))
    assert max_err < 1e-4, f"mismatch vs reference: {max_err}"

    # ---- batched / gridded path: slab stays VMEM-resident across the grid ----
    big_b = 64
    sense_big = jax.random.normal(jax.random.fold_in(kx, 1), (big_b, IN_DIM), jnp.float32)
    out_big = jax.block_until_ready(
        agi_gradient_forward(sense_big, slab, batch_tile=BATCH))
    ref_big = reference_forward(sense_big, params)
    assert out_big.shape == (big_b, OUT_DIM), out_big.shape
    max_err_big = float(jnp.max(jnp.abs(out_big - ref_big)))
    assert max_err_big < 1e-4, f"mismatch vs reference (batched): {max_err_big}"

    print("KERNEL_OK")
</pallas_src>

<mosaic_0001>
module attributes {stable_mosaic.version = 11 : i64} {
  func.func @agi_kernel(%arg0: i32, %arg1: memref<8x16xf32, #tpu.memory_space<vmem>>, %arg2: memref<56x128xf32, #tpu.memory_space<vmem>>, %arg3: memref<8x8xf32, #tpu.memory_space<vmem>>) attributes {dimension_semantics = [#tpu.dimension_semantics<parallel>], iteration_bounds = array<i64: 1>, scalar_prefetch = 0 : i64, scratch_operands = 0 : i64, tpu.core_type = #tpu.core_type<tc>, window_params = [{transform_indices = @transform_0, window_bounds = array<i64: 8, 16>}, {pipeline_mode = #tpu.pipeline_mode<synchronous>, transform_indices = @transform_1, window_bounds = array<i64: 56, 128>}, {transform_indices = @transform_2, window_bounds = array<i64: 8, 8>}]} {
    %c0 = arith.constant 0 : index
    %c0_0 = arith.constant 0 : index
    %0 = vector.load %arg1[%c0, %c0_0] : memref<8x16xf32, #tpu.memory_space<vmem>>, vector<8x16xf32>
    %c32 = arith.constant 32 : index
    %c0_1 = arith.constant 0 : index
    %1 = vector.load %arg2[%c32, %c0_1] : memref<56x128xf32, #tpu.memory_space<vmem>>, vector<16x48xf32>
    %c49 = arith.constant 49 : index
    %c0_2 = arith.constant 0 : index
    %2 = vector.load %arg2[%c49, %c0_2] : memref<56x128xf32, #tpu.memory_space<vmem>>, vector<1x48xf32>
    %cst = arith.constant dense<0.000000e+00> : vector<8x48xf32>
    %3 = tpu.matmul %0, %1, %cst {dimension_numbers = #tpu.dot_dimension_numbers<[1], [0], [0], [1], [0, 0, 1, 1], [], []>} : vector<8x16xf32>, vector<16x48xf32>, vector<8x48xf32> -> vector<8x48xf32>
    %4 = vector.broadcast %2 : vector<1x48xf32> to vector<8x48xf32>
    %5 = arith.addf %3, %4 : vector<8x48xf32>
    %6 = vector.extract_strided_slice %5 {offsets = [0, 0], sizes = [8, 32], strides = [1, 1]} : vector<8x48xf32> to vector<8x32xf32>
    %cst_3 = arith.constant 5.000000e-01 : f32
    %7 = vector.broadcast %cst_3 : f32 to vector<8x32xf32>
    %8 = arith.mulf %7, %6 : vector<8x32xf32>
    %cst_4 = arith.constant 0.707106769 : f32
    %9 = vector.broadcast %cst_4 : f32 to vector<8x32xf32>
    %10 = arith.mulf %6, %9 : vector<8x32xf32>
    %11 = math.erf %10 : vector<8x32xf32>
    %cst_5 = arith.constant 1.000000e+00 : f32
    %12 = vector.broadcast %cst_5 : f32 to vector<8x32xf32>
    %13 = arith.addf %12, %11 : vector<8x32xf32>
    %14 = arith.mulf %8, %13 : vector<8x32xf32>
    %15 = vector.extract_strided_slice %5 {offsets = [0, 32], sizes = [8, 16], strides = [1, 1]} : vector<8x48xf32> to vector<8x16xf32>
    %c0_6 = arith.constant 0 : index
    %c0_7 = arith.constant 0 : index
    %16 = vector.load %arg2[%c0_6, %c0_7] : memref<56x128xf32, #tpu.memory_space<vmem>>, vector<32x96xf32>
    %c48 = arith.constant 48 : index
    %c0_8 = arith.constant 0 : index
    %17 = vector.load %arg2[%c48, %c0_8] : memref<56x128xf32, #tpu.memory_space<vmem>>, vector<1x96xf32>
    %cst_9 = arith.constant dense<0.000000e+00> : vector<8x96xf32>
    %18 = tpu.matmul %14, %16, %cst_9 {dimension_numbers = #tpu.dot_dimension_numbers<[1], [0], [0], [1], [0, 0, 1, 1], [], []>} : vector<8x32xf32>, vector<32x96xf32>, vector<8x96xf32> -> vector<8x96xf32>
    %19 = vector.broadcast %17 : vector<1x96xf32> to vector<8x96xf32>
    %20 = arith.addf %18, %19 : vector<8x96xf32>
    %21 = arith.negf %20 : vector<8x96xf32>
    %22 = math.exp %21 : vector<8x96xf32>
    %cst_10 = arith.constant 1.000000e+00 : f32
    %23 = vector.broadcast %cst_10 : f32 to vector<8x96xf32>
    %24 = arith.addf %23, %22 : vector<8x96xf32>
    %25 = arith.divf %23, %24 : vector<8x96xf32>
    %26 = math.tanh %20 : vector<8x96xf32>
    %27 = vector.extract_strided_slice %25 {offsets = [0, 0], sizes = [8, 32], strides = [1, 1]} : vector<8x96xf32> to vector<8x32xf32>
    %28 = vector.extract_strided_slice %26 {offsets = [0, 32], sizes = [8, 32], strides = [1, 1]} : vector<8x96xf32> to vector<8x32xf32>
    %29 = vector.extract_strided_slice %25 {offsets = [0, 64], sizes = [8, 32], strides = [1, 1]} : vector<8x96xf32> to vector<8x32xf32>
    %30 = arith.mulf %27, %28 : vector<8x32xf32>
    %31 = math.tanh %30 : vector<8x32xf32>
    %32 = arith.mulf %29, %31 : vector<8x32xf32>
    %c0_11 = arith.constant 0 : index
    %c96 = arith.constant 96 : index
    %33 = vector.load %arg2[%c0_11, %c96] : memref<56x128xf32, #tpu.memory_space<vmem>>, vector<32x16xf32>
    %cst_12 = arith.constant dense<0.000000e+00> : vector<8x16xf32>
    %34 = tpu.matmul %32, %33, %cst_12 {dimension_numbers = #tpu.dot_dimension_numbers<[1], [0], [0], [1], [0, 0, 1, 1], [], []>} : vector<8x32xf32>, vector<32x16xf32>, vector<8x16xf32> -> vector<8x16xf32>
    %35 = arith.addf %15, %34 : vector<8x16xf32>
    %cst_13 = arith.constant 5.000000e-01 : f32
    %36 = vector.broadcast %cst_13 : f32 to vector<8x16xf32>
    %37 = arith.mulf %36, %35 : vector<8x16xf32>
    %cst_14 = arith.constant 0.707106769 : f32
    %38 = vector.broadcast %cst_14 : f32 to vector<8x16xf32>
    %39 = arith.mulf %35, %38 : vector<8x16xf32>
    %40 = math.erf %39 : vector<8x16xf32>
    %cst_15 = arith.constant 1.000000e+00 : f32
    %41 = vector.broadcast %cst_15 : f32 to vector<8x16xf32>
    %42 = arith.addf %41, %40 : vector<8x16xf32>
    %43 = arith.mulf %37, %42 : vector<8x16xf32>
    %c32_16 = arith.constant 32 : index
    %c48_17 = arith.constant 48 : index
    %44 = vector.load %arg2[%c32_16, %c48_17] : memref<56x128xf32, #tpu.memory_space<vmem>>, vector<16x8xf32>
    %c48_18 = arith.constant 48 : index
    %c96_19 = arith.constant 96 : index
    %45 = vector.load %arg2[%c48_18, %c96_19] : memref<56x128xf32, #tpu.memory_space<vmem>>, vector<1x8xf32>
    %cst_20 = arith.constant dense<0.000000e+00> : vector<8x8xf32>
    %46 = tpu.matmul %43, %44, %cst_20 {dimension_numbers = #tpu.dot_dimension_numbers<[1], [0], [0], [1], [0, 0, 1, 1], [], []>} : vector<8x16xf32>, vector<16x8xf32>, vector<8x8xf32> -> vector<8x8xf32>
    %47 = vector.broadcast %45 : vector<1x8xf32> to vector<8x8xf32>
    %48 = arith.addf %46, %47 : vector<8x8xf32>
    %c0_21 = arith.constant 0 : index
    %c0_22 = arith.constant 0 : index
    %49 = vector.load %arg3[%c0_21, %c0_22] : memref<8x8xf32, #tpu.memory_space<vmem>>, vector<8x8xf32>
    tpu.vector_store %arg3[%c0_21, %c0_22], %48 {strides = array<i32>} : memref<8x8xf32, #tpu.memory_space<vmem>>, vector<8x8xf32>,
    return
  }
  func.func @transform_0(%arg0: i32) -> (i32, i32) {
    %c0_i32 = arith.constant 0 : i32
    %c0_i32_0 = arith.constant 0 : i32
    return %arg0, %c0_i32 : i32, i32
  }
  func.func @transform_1(%arg0: i32) -> (i32, i32) {
    %c0_i32 = arith.constant 0 : i32
    %c0_i32_0 = arith.constant 0 : i32
    %c0_i32_1 = arith.constant 0 : i32
    return %c0_i32, %c0_i32_0 : i32, i32
  }
  func.func @transform_2(%arg0: i32) -> (i32, i32) {
    %c0_i32 = arith.constant 0 : i32
    %c0_i32_0 = arith.constant 0 : i32
    return %arg0, %c0_i32 : i32, i32
  }
}

</mosaic_0001>

<bundles_post_ra>
// kernel: tpu_custom_call.1
= control target key start
LH: loop header
LB: loop body
LE: loop exit
PB: predicated region body
PF: predicated region fallthrough
CT: control target
= control target key end

     0   :  { %7 = vsyncpa [#allocation3], 0  ;;  %s721_s0 = inlined_call_operand.hbm [shape: f32[8,16], index: 0, kind: input, shape index: {}]   ;;  %s722_s1 = inlined_call_operand.hbm [shape: f32[56,128], index: 1, kind: input, shape index: {}]   ;;  %s723_s2 = inlined_call_operand.hbm [shape: f32[8,8], index: 2, kind: output, shape index: {}]  }
   0x1   :  { %8 = vsyncpa [#allocation6], 0 }
   0x2   :  { %9 = vsyncpa [#allocation4], 0  ;;  %s620_s9 = smov [#allocation2]   ;;  %s621_s11 = smov [#allocation5]  }
   0x3   :  { %s16_s10 = sshll.u32 %s620_s9, 4  ;;  %s25_s12 = sshll.u32 %s621_s11, 4  ;;  %s17_s10 = int_to_ptr.vmem [resolvable:$true] %s16_s10  ;;  %s647_s12 = int_to_ptr.vmem [resolvable:$true] %s25_s12 }
   0x4   :  { %s548_s15 = scalar_lea.hbm %s721_s0, 128 }
   0x5   :  { %p549_p0 = scmp.ne.s32.totalorder %s721_s0, %s548_s15  ;;  %p552_p1 = scmp.lt.u32.totalorder %s548_s15, %s721_s0 }
   0x7   :  { %p554_p2 = pnand %p552_p1, %p549_p0 }
   0x9   :  { %557 = shalt.err (!%p554_p2)
}
   0xa   :  { %s558_s20 = scalar_lea.vmem %s17_s10, 128  ;;  %p563_p4 = scmp.lt.s32.totalorder %s17_s10, %s17_s10 }
   0xb   :  { %p559_p3 = scmp.ne.s32.totalorder %s17_s10, %s558_s20  ;;  %p564_p5 = scmp.lt.s32.totalorder %s558_s20, %s558_s20 }
   0xd   :  { %p565_p6 = por %p564_p5, %p563_p4 }
   0xf   :  { %p566_p7 = pnand %p565_p6, %p559_p3 }
  0x11   :  { %569 = shalt.err (!%p566_p7)
}
  0x12   :  { %19 = dma.hbm_to_vmem [thread:$0]  %s721_s0, 128, %s17_s10, [#allocation3]  }
  0x13   :  { %s570_s25 = scalar_lea.hbm %s722_s1, 896 }
  0x14   :  { %p571_p8 = scmp.ne.s32.totalorder %s722_s1, %s570_s25  ;;  %p574_p9 = scmp.lt.u32.totalorder %s570_s25, %s722_s1 }
  0x16   :  { %p576_p10 = pnand %p574_p9, %p571_p8 }
  0x18   :  { %579 = shalt.err (!%p576_p10)
}
  0x19   :  { %s580_s30 = scalar_lea.vmem %s647_s12, 896  ;;  %p585_p12 = scmp.lt.s32.totalorder %s647_s12, %s647_s12 }
  0x1a   :  { %p581_p11 = scmp.ne.s32.totalorder %s647_s12, %s580_s30  ;;  %p586_p13 = scmp.lt.s32.totalorder %s580_s30, %s580_s30 }
  0x1c   :  { %p587_p0 = por %p586_p13, %p585_p12 }
  0x1e   :  { %p588_p1 = pnand %p587_p0, %p581_p11 }
  0x20   :  { %591 = shalt.err (!%p588_p1)
}
  0x21   :  { %s622_s0 = smov 128   ;;  %s623_s3 = smov 8  }
  0x22   :  { %31 = dma.hbm_to_vmem [thread:$0]  %s722_s1, 896, %s647_s12, [#allocation6], %s622_s0, %s622_s0, %s623_s3  }
  0x23   :  { %614 = dma.done.wait [#allocation3], 128  }
  0x24   :  { %615 = vsyncadd [#allocation3], 4294967168 }
  0x25   :  { %616 = dma.done.wait [#allocation6], 896  }
  0x26   :  { %617 = vsyncadd [#allocation6], 4294966400  ;;  %v624_v0 = vmov 0.0|0.0   ;;  %vm625_vm0 = vmmov 0   ;;  %v626_v1 = vmov 0.0   ;;  %v682_v2 = vld [vmem:[#allocation5 + $0x20] sm:$0xff] }
  0x27   :  { %491 = vmatprep.subr.bf16.mxu0 %v624_v0  ;;  %459 = vmatprep.mubr.msk.f32.mxu0 %vm625_vm0, %v626_v1  ;;  %v684_v3 = vld [vmem:[#allocation5 + $0x28] sm:$0xff]  ;;  %v38_v6 = vld [vmem:[#allocation2] sm:$0xff]  ;;  %vm46_vm1 = vcmask 130048   ;;  %v125_v7 = vld [vmem:[#allocation5] sm:$0xff]  ;;  %vm134_vm2 = vcmask 261120   ;;  %s627_s1 = smov 96  }
  0x28   :  { %494 = vmatprep.subr.bf16.mxu1 %v624_v0  ;;  %470 = vmatprep.mubr.msk.f32.mxu1 %vm625_vm0, %v626_v1  ;;  %v531_v4 = vpack.i.bf16 %v684_v3, %v682_v2  ;;  %v492_v5 = vpack.c.bf16 %v684_v3, %v682_v2  ;;  %v126_v8 = vld [vmem:[#allocation5 + $0x8] sm:$0xff]  ;;  %v127_v10 = vld [vmem:[#allocation5 + $0x10] sm:$0xff]  ;;  %v128_v11 = vld [vmem:[#allocation5 + $0x18] sm:$0xff]  ;;  %s628_s6 = smov 32   ;;  %s629_s7 = smov 64   ;;  %vm414_vm3 = vcmask 64512  }
  0x29   :  { %v495_v9 = vpack.c.bf16 %v126_v8, %v125_v7  ;;  %v498_v12 = vpack.c.bf16 %v128_v11, %v127_v10  ;;  %v432_v13 = vld [vmem:[#allocation5 + $0x31] ss:$0 sm:$0xff]  ;;  %v434_v22 = vld [vmem:[#allocation5 + $0x30] ss:$0 sm:$0xff]  ;;  %v521_v27 = vpack.i.bf16 %v126_v8, %v125_v7  ;;  %v526_v28 = vpack.i.bf16 %v128_v11, %v127_v10  ;;  %s630_s8 = smov 80   ;;  %s631_s9 = smov [#allocation7]  }
  0x2a   :  { %493 = vmatpush3.bf16.msra.mxu0 %v492_v5  ;;  %s422_s10 = sshll.u32 %s631_s9, 4  ;;  %s423_s10 = int_to_ptr.vmem [resolvable:$true] %s422_s10 }
  0x2b   :  { %500 = vmatprep.subr.bf16.mxu0 %v624_v0  ;;  %496 = vmatpush3.bf16.msra.mxu1 %v495_v9  ;;  %s592_s11 = scalar_lea.vmem %s423_s10, 128  ;;  %p597_p3 = scmp.lt.s32.totalorder %s423_s10, %s423_s10 }
  0x2c   :  { %497 = vmatprep.subr.bf16.mxu1 %v624_v0  ;;  %522 = vrot.lane.b32.xlu1 %v521_v27, %s628_s6  ;;  %p593_p2 = scmp.ne.s32.totalorder %s423_s10, %s592_s11  ;;  %p598_p4 = scmp.lt.s32.totalorder %s592_s11, %s592_s11 }
  0x2d   :  { %460 = vmatmul.mubr.msk.f32.vlgmr.msra.gmra.mrb[0].mxu0 %vm46_vm1, %v38_v6 }
  0x2e   :  { %481 = vmatprep.mubr.msk.f32.mxu0 %vm625_vm0, %v626_v1  ;;  %p599_p5 = por %p598_p4, %p597_p3 }
  0x2f   :  { %499 = vmatpush3.bf16.msra.mxu1 %v498_v12 }
  0x30   :  { %506 = vmatprep.subr.bf16.mxu1 %v624_v0  ;;  %527 = vrot.lane.b32.xlu1 %v526_v28, %s628_s6  ;;  %p600_p6 = pnand %p599_p5, %p593_p2 }
  0x9e   :  { %v523_v35 = vpop.permute.xlu1 %522 }
  0x9f   :  { %v525_v36 = vunpack.i.h.bf16 %v523_v35  ;;  %v524_v37 = vunpack.i.l.bf16 %v523_v35 }
  0xa1   :  { %v501_v38 = vpack.c.bf16 %v525_v36, %v524_v37 }
  0xa2   :  { %v528_v39 = vpop.permute.xlu1 %527 }
  0xa3   :  { %v530_v40 = vunpack.i.h.bf16 %v528_v39  ;;  %v529_v41 = vunpack.i.l.bf16 %v528_v39  ;;  %502 = vmatpush3.bf16.msra.mxu0 %v501_v38 }
  0xa4   :  { %503 = vmatprep.subr.bf16.mxu0 %v624_v0 }
  0xa5   :  { %v504_v42 = vpack.c.bf16 %v530_v40, %v529_v41 }
  0xa7   :  { %505 = vmatpush3.bf16.msra.mxu0 %v504_v42 }
 0x100   :  { %v116_v14 = vpop.f32.mrb[0].mxu0 }
 0x101   :  { %v117_v15 = vadd.f32 %v432_v13, %v116_v14  ;;  %v461_v16 = vpop.f32.mrb[1].mxu0 }
 0x103   :  { %v121_v17 = vmul.f32 0.70710677, %v117_v15  ;;  %v120_v19 = vmul.f32 0.5, %v117_v15 }
 0x105   :  { %536 = verf.f32 %v121_v17 }
 0x10f   :  { %v537_v18 = vpop.eup %536 }
 0x110   :  { %v123_v20 = vadd.f32 1.0, %v537_v18 }
 0x112   :  { %v124_v21 = vmul.f32 %v123_v20, %v120_v19 }
 0x114   :  { %471 = vmatmul.mubr.msk.f32.vlgmr.msra.gmra.mrb[0].mxu1 %vm134_vm2, %v124_v21 }
 0x115   :  { %488 = vmatprep.mubr.msk.f32.mxu1 %vm625_vm0, %v626_v1 }
 0x1e7   :  { %v204_v23 = vpop.f32.mrb[0].mxu1 }
 0x1e8   :  { %v205_v24 = vadd.f32 %v434_v22, %v204_v23  ;;  %v472_v25 = vpop.f32.mrb[1].mxu1 }
 0x1ea   :  { %538 = vtanh.f32 %v205_v24  ;;  %v436_v29 = vmul.f32 -1.442695, %v205_v24 }
 0x1ec   :  { %540 = vpow2.f32 %v436_v29 }
 0x1f4   :  { %v539_v26 = vpop.eup %538 }
 0x1f5   :  { %216 = vrot.lane.b32.xlu0 %v539_v26, %s627_s1 }
 0x1f6   :  { %v541_v30 = vpop.eup %540 }
 0x1f7   :  { %v211_v31 = vadd.f32 1.0, %v541_v30 }
 0x1f9   :  { %542 = vrcp.f32 %v211_v31 }
 0x203   :  { %v543_v32 = vpop.eup %542 }
 0x267   :  { %v217_v33 = vpop.permute.xlu0 %216 }
 0x268   :  { %v219_v34 = vmul.f32 %v543_v32, %v217_v33 }
 0x26a   :  { %544 = vtanh.f32 %v219_v34 }
 0x274   :  { %v545_v43 = vpop.eup %544 }
 0x275   :  { %222 = vrot.lane.b32.xlu0 %v545_v43, %s629_s7 }
 0x2e7   :  { %v223_v44 = vpop.permute.xlu0 %222 }
 0x2e8   :  { %v225_v45 = vmul.f32 %v543_v32, %v223_v44 }
 0x2ea   :  { %227 = vrot.lane.b32.xlu0 %v225_v45, %s629_s7 }
 0x2ee   :  { %532 = vrot.lane.b32.xlu0 %v531_v4, %s630_s8 }
 0x2f2   :  { %339 = vrot.lane.b32.xlu0 %v434_v22, %s628_s6 }
 0x35c   :  { %v228_v46 = vpop.permute.xlu0 %227 }
 0x35d   :  { %482 = vmatmul.mubr.msk.f32.vlgmr.msra.gmra.mrb[2].mxu0 %vm134_vm2, %v228_v46 }
 0x360   :  { %v533_v49 = vpop.permute.xlu0 %532 }
 0x361   :  { %v535_v51 = vunpack.i.h.bf16 %v533_v49  ;;  %v534_v52 = vunpack.i.l.bf16 %v533_v49 }
 0x363   :  { %v507_v54 = vpack.c.bf16 %v535_v51, %v534_v52 }
 0x364   :  { %v340_v61 = vpop.permute.xlu0 %339 }
 0x365   :  { %508 = vmatpush3.bf16.msra.mxu1 %v507_v54 }
 0x430   :  { %v313_v47 = vpop.f32.mrb[2].mxu0 }
 0x431   :  { %318 = vrot.lane.b32.xlu1 %v313_v47, %s628_s6  ;;  %v483_v48 = vpop.f32.mrb[3].mxu0 }
 0x4a3   :  { %v319_v50 = vpop.permute.xlu1 %318 }
 0x4a4   :  { %v321_v53 = vadd.f32 %v319_v50, %v117_v15 }
 0x4a6   :  { %v323_v55 = vmul.f32 0.70710677, %v321_v53  ;;  %v322_v57 = vmul.f32 0.5, %v321_v53 }
 0x4a8   :  { %546 = verf.f32 %v323_v55 }
 0x4b2   :  { %v547_v56 = vpop.eup %546 }
 0x4b3   :  { %v325_v58 = vadd.f32 1.0, %v547_v56 }
 0x4b5   :  { %v326_v59 = vmul.f32 %v325_v58, %v322_v57 }
 0x4b7   :  { %328 = vrot.lane.b32.xlu1 %v326_v59, %s627_s1 }
 0x529   :  { %v329_v60 = vpop.permute.xlu1 %328 }
 0x52a   :  { %489 = vmatmul.mubr.msk.f32.vlgmr.msra.gmra.mrb[2].mxu1 %vm46_vm1, %v329_v60 }
 0x5fd   :  { %v410_v62 = vpop.f32.mrb[2].mxu1 }
 0x5fe   :  { %v411_v63 = vadd.f32 %v410_v62, %v340_v61  ;;  %v490_v0 = vpop.f32.mrb[3].mxu1 }
 0x600   :  { %415 = vst.msk [vmem:[#allocation7] sm:$0xff] %vm414_vm3, %v411_v63 }
 0x601   :  { %603 = shalt.err (!%p600_p6)
}
 0x602   :  { %s604_s14 = scalar_lea.hbm %s723_s2, 128 }
 0x603   :  { %p605_p7 = scmp.ne.s32.totalorder %s723_s2, %s604_s14  ;;  %p608_p8 = scmp.lt.u32.totalorder %s604_s14, %s723_s2 }
 0x605   :  { %p610_p9 = pnand %p608_p8, %p605_p7 }
 0x607   :  { %613 = shalt.err (!%p610_p9)
}
 0x608   :  { %425 = dma.vmem_to_hbm [thread:$0]  %s423_s10, 128, %s723_s2, [#allocation4]  }
 0x609   :  { %618 = dma.done.wait [#allocation4], 128  }
 0x60a   :  { %619 = vsyncadd [#allocation4], 4294967168 }
 0x60b   :  { %429 = vsyncpa [#allocation3], 1 }
 0x60c   :  { %430 = vsyncpa [#allocation6], 1 }
 0x60d   :  { %431 = vsyncpa [#allocation4], 1 }

</bundles_post_ra>
